<compile_context>
chip_gen: v7x
topology: tpu7x:2x2x1
jax: 0.10.0
libtpu: 0.0.40
codegen_flags: <defaults>
</compile_context>

<pallas_src>
import functools

import jax
import jax.numpy as jnp
from jax.experimental import pallas as pl
from jax.experimental.pallas import tpu as pltpu

_VMEM_LIMIT = 32 * 1024 * 1024   # fits v5e/v6e and stays under v7x's 64 MiB


# ------------------------------ small helpers ------------------------------ #

def _round_up(x, m):
    return (x + m - 1) // m * m


def _full_spec(shape):
    n = len(shape)
    return pl.BlockSpec(shape, lambda *_, n=n: (0,) * n)


# ------------------------------ Pallas kernels ------------------------------ #

def _conv_pool_relu_kernel(p_ref, w_ref, shift_ref, o_ref):
    """Fused Conv(one matmul) + folded-BN shift + MaxPool2x2 + ReLU.

    p_ref:     (4, tm, CK)  im2col patches, one plane per 2x2 pool quadrant
    w_ref:     (CK, Kpad)   conv weight with BN scale folded in (128-padded)
    shift_ref: (1, Kpad)    folded BN shift (applied once, after the max)
    o_ref:     (tm, Kpad)   pooled + ReLU'd output rows (lane-dense)
    """
    q, tm, ck = p_ref.shape
    kpad = w_ref.shape[1]
    # Single MXU pass for all 4 pool quadrants (free leading-dim collapse).
    p2 = p_ref[...].reshape(q * tm, ck)
    y = jnp.dot(p2, w_ref[...], preferred_element_type=jnp.float32)
    y = y.reshape(q, tm, kpad)
    m = jnp.max(y, axis=0)                 # 2x2 max pool over quadrants
    m = m + shift_ref[...]                 # + shift commutes with max
    o_ref[...] = jnp.maximum(m, 0.0).astype(o_ref.dtype)


def _fc_head_kernel(*refs, n_layers):
    """Fused FC head: (Linear + ReLU) * (n_layers-1) + final Linear.

    refs = (x_ref, w1, b1, w2, b2, ..., wN, bN, o_ref), all 128-padded.
    Weights/activations may be bf16; accumulation and bias add are f32.
    """
    x_ref = refs[0]
    o_ref = refs[-1]
    h = x_ref[...]
    for i in range(n_layers):
        w = refs[1 + 2 * i][...]
        b = refs[2 + 2 * i][...]
        h = jnp.dot(h.astype(w.dtype), w, preferred_element_type=jnp.float32) + b
        if i < n_layers - 1:
            h = jnp.maximum(h, 0.0)
    o_ref[...] = h.astype(o_ref.dtype)


# ------------------------------ pallas_call wrappers ------------------------ #

def _conv_pool_call(p4, w2, shift, tm):
    """p4:(4,Mp,CK)  w2:(CK,Kpad)  shift:(1,Kpad)  ->  (Mp,Kpad) f32."""
    _, Mp, CK = p4.shape
    Kpad = w2.shape[1]
    return pl.pallas_call(
        _conv_pool_relu_kernel,
        out_shape=jax.ShapeDtypeStruct((Mp, Kpad), jnp.float32),
        grid=(Mp // tm,),
        in_specs=[
            pl.BlockSpec((4, tm, CK), lambda i: (0, i, 0)),
            pl.BlockSpec((CK, Kpad), lambda i: (0, 0)),   # resident weight
            pl.BlockSpec((1, Kpad), lambda i: (0, 0)),    # resident shift
        ],
        out_specs=pl.BlockSpec((tm, Kpad), lambda i: (i, 0)),
        compiler_params=pltpu.CompilerParams(
            dimension_semantics=("parallel",),
            vmem_limit_bytes=_VMEM_LIMIT,
        ),
    )(p4, w2, shift)


def conv_block(x_nhwc, p, use_bf16, eps=1e-5):
    """Conv2d(k=3, no pad) + BatchNorm2d(eval) + MaxPool2d(2) + ReLU."""
    N, H, W, C = x_nhwc.shape
    K = p["w"].shape[0]
    OH, OW = H - 2, W - 2
    PH, PW = OH // 2, OW // 2
    Kpad = _round_up(K, 128)
    CK = C * 9

    # im2col in PyTorch (c, kh, kw) flatten order, then reorder by pool
    # quadrant so the kernel never needs strided slices.
    # TODO(synk): move this in-kernel via shifted ref slices for large images.
    cols = [x_nhwc[:, dh:dh + OH, dw:dw + OW, :]
            for dh in range(3) for dw in range(3)]
    patches = jnp.stack(cols, axis=-1).reshape(N, OH, OW, CK)
    quads = [patches[:, dr:2 * PH:2, dc:2 * PW:2, :].reshape(N * PH * PW, CK)
             for dr in range(2) for dc in range(2)]
    p4 = jnp.stack(quads, axis=0)                          # (4, M, CK)

    # Fold conv bias + BN into per-channel scale/shift; fold the SCALE into the
    # weight columns (exact), keep only the SHIFT for the kernel.
    inv_std = 1.0 / jnp.sqrt(p["var"] + eps)
    scale = p["gamma"] * inv_std                           # (K,)
    shift = p["beta"] + (p["b"] - p["mean"]) * scale       # (K,)
    w2 = jnp.transpose(p["w"].reshape(K, CK)) * scale[None, :]   # (CK, K)
    w2 = jnp.pad(w2, ((0, 0), (0, Kpad - K)))
    shift = jnp.pad(shift, (0, Kpad - K)).reshape(1, Kpad)

    # Tile the pooled-row dimension: >= 2 grid steps when possible (v7x has
    # 2 TensorCores), 16-aligned (bf16 sublane packing), capped at 512 rows.
    M = N * PH * PW
    if M <= 16:
        tm = 16
    else:
        tm = min(512, _round_up((M + 1) // 2, 16))
    Mp = _round_up(M, tm)
    p4 = jnp.pad(p4, ((0, 0), (0, Mp - M), (0, 0)))

    if use_bf16:
        p4 = p4.astype(jnp.bfloat16)
        w2 = w2.astype(jnp.bfloat16)

    out = _conv_pool_call(p4, w2, shift, tm)               # (Mp, Kpad) f32
    return out[:M, :K].reshape(N, PH, PW, K)


def fc_head(x, fc_params, out_params, use_bf16):
    """Fused (Linear+ReLU)*len(fcs) + final Linear in one pallas_call."""
    N, F = x.shape
    Np = _round_up(N, 16)
    layers = list(fc_params) + [out_params]
    act_dtype = jnp.bfloat16 if use_bf16 else jnp.float32

    x_p = jnp.pad(x, ((0, Np - N), (0, _round_up(F, 128) - F))).astype(act_dtype)
    args = [x_p]
    specs = [_full_spec(x_p.shape)]
    for p in layers:
        n_out, n_in = p["w"].shape
        d_in, d_out = _round_up(n_in, 128), _round_up(n_out, 128)
        w = jnp.pad(jnp.transpose(p["w"]),
                    ((0, d_in - n_in), (0, d_out - n_out))).astype(act_dtype)
        b = jnp.pad(p["b"], (0, d_out - n_out)).reshape(1, d_out)
        args += [w, b]
        specs += [_full_spec(w.shape), _full_spec(b.shape)]

    n_out_last = layers[-1]["w"].shape[0]
    d_out_last = _round_up(n_out_last, 128)
    kern = functools.partial(_fc_head_kernel, n_layers=len(layers))
    # TODO(synk): for large FC widths, grid over batch rows and tile the
    # contraction with a VMEM f32 accumulator instead of all-resident weights.
    out = pl.pallas_call(
        kern,
        out_shape=jax.ShapeDtypeStruct((Np, d_out_last), jnp.float32),
        in_specs=specs,
        out_specs=_full_spec((Np, d_out_last)),
        compiler_params=pltpu.CompilerParams(vmem_limit_bytes=_VMEM_LIMIT),
    )(*args)
    return out[:N, :n_out_last]


def simple_cnn_forward(x_nchw, params, use_bf16=False):
    x = jnp.transpose(x_nchw, (0, 2, 3, 1))                # NCHW -> NHWC
    for p in params["convs"]:
        x = conv_block(x, p, use_bf16)
    # flatten exactly like PyTorch's x.view(-1, C*H*W)
    x = jnp.transpose(x, (0, 3, 1, 2)).reshape(x.shape[0], -1)
    return fc_head(x, params["fcs"], params["out"], use_bf16)


# ----------------------------- params / reference --------------------------- #

def init_params(key, inp_shape, convs, fcs, n_classes):
    C, H, W = inp_shape
    params = {"convs": [], "fcs": [], "out": {}}
    in_c, h, w = C, H, W
    for out_c in convs:
        key, k1, k2, k3, k4, k5, k6 = jax.random.split(key, 7)
        params["convs"].append({
            "w": 0.1 * jax.random.normal(k1, (out_c, in_c, 3, 3), jnp.float32),
            "b": 0.1 * jax.random.normal(k2, (out_c,), jnp.float32),
            "gamma": 1.0 + 0.1 * jax.random.normal(k3, (out_c,), jnp.float32),
            "beta": 0.1 * jax.random.normal(k4, (out_c,), jnp.float32),
            "mean": 0.1 * jax.random.normal(k5, (out_c,), jnp.float32),
            "var": 1.0 + 0.1 * jax.random.uniform(k6, (out_c,), jnp.float32),
        })
        in_c = out_c
        h, w = (h - 2) // 2, (w - 2) // 2
    n_in = in_c * h * w
    for n_out in fcs:
        key, k1, k2 = jax.random.split(key, 3)
        params["fcs"].append({
            "w": 0.1 * jax.random.normal(k1, (n_out, n_in), jnp.float32),
            "b": 0.1 * jax.random.normal(k2, (n_out,), jnp.float32),
        })
        n_in = n_out
    key, k1, k2 = jax.random.split(key, 3)
    params["out"] = {
        "w": 0.1 * jax.random.normal(k1, (n_classes, n_in), jnp.float32),
        "b": 0.1 * jax.random.normal(k2, (n_classes,), jnp.float32),
    }
    return params


def _im2col_3x3(x_nhwc):
    N, H, W, C = x_nhwc.shape
    OH, OW = H - 2, W - 2
    cols = [x_nhwc[:, dh:dh + OH, dw:dw + OW, :]
            for dh in range(3) for dw in range(3)]
    patches = jnp.stack(cols, axis=-1)                    # (N, OH, OW, C, 9)
    return patches.reshape(N * OH * OW, C * 9)


def _ref_forward(x_nchw, params, eps=1e-5):
    """Pure-jnp reference of the same forward semantics (no Pallas)."""
    x = jnp.transpose(x_nchw, (0, 2, 3, 1))
    for p in params["convs"]:
        N, H, W, C = x.shape
        K = p["w"].shape[0]
        OH, OW = H - 2, W - 2
        y = _im2col_3x3(x) @ jnp.transpose(p["w"].reshape(K, C * 9)) + p["b"]
        y = (y - p["mean"]) / jnp.sqrt(p["var"] + eps) * p["gamma"] + p["beta"]
        y = y.reshape(N, OH, OW, K)
        PH, PW = OH // 2, OW // 2
        y = y[:, :2 * PH, :2 * PW, :].reshape(N, PH, 2, PW, 2, K).max(axis=(2, 4))
        x = jnp.maximum(y, 0.0)
    x = jnp.transpose(x, (0, 3, 1, 2)).reshape(x.shape[0], -1)
    for p in params["fcs"]:
        x = jnp.maximum(x @ p["w"].T + p["b"], 0.0)
    return x @ params["out"]["w"].T + params["out"]["b"]


# ----------------------------------- main ----------------------------------- #

if __name__ == "__main__":
    key = jax.random.PRNGKey(0)
    n_classes, convs_cfg, fcs_cfg = 10, [8, 16], [32]
    inp_shape = [4, 16, 16]   # (C,H,W): 16 -> conv 14 -> pool 7 -> conv 5 -> pool 2

    kp, kx = jax.random.split(key)
    params = init_params(kp, inp_shape, convs_cfg, fcs_cfg, n_classes)
    x = jax.random.normal(kx, (2, *inp_shape), jnp.float32)

    fwd = jax.jit(simple_cnn_forward, static_argnames=("use_bf16",))
    ref = _ref_forward(x, params)

    # f32 path: exact-mode self-check.
    out = jax.block_until_ready(fwd(x, params, use_bf16=False))
    assert out.shape == (2, n_classes), out.shape
    assert jnp.allclose(out, ref, atol=1e-4, rtol=1e-4), "f32 Pallas vs reference mismatch"

    # bf16-fed MXU path (v6e/v7x recommendation): relaxed tolerance.
    out_bf16 = jax.block_until_ready(fwd(x, params, use_bf16=True))
    assert out_bf16.shape == (2, n_classes), out_bf16.shape
    assert jnp.allclose(out_bf16, ref, atol=5e-2, rtol=5e-2), "bf16 Pallas vs reference mismatch"

    print("KERNEL_OK")
</pallas_src>

<mosaic_0001>
module attributes {stable_mosaic.version = 11 : i64} {
  func.func @_conv_pool_relu_kernel(%arg0: i32, %arg1: memref<4x64x36xf32, #tpu.memory_space<vmem>>, %arg2: memref<36x128xf32, #tpu.memory_space<vmem>>, %arg3: memref<1x128xf32, #tpu.memory_space<vmem>>, %arg4: memref<64x128xf32, #tpu.memory_space<vmem>>) attributes {dimension_semantics = [#tpu.dimension_semantics<parallel>], iteration_bounds = array<i64: 2>, scalar_prefetch = 0 : i64, scratch_operands = 0 : i64, tpu.core_type = #tpu.core_type<tc>, window_params = [{transform_indices = @transform_0, window_bounds = array<i64: 4, 64, 36>}, {pipeline_mode = #tpu.pipeline_mode<synchronous>, transform_indices = @transform_1, window_bounds = array<i64: 36, 128>}, {pipeline_mode = #tpu.pipeline_mode<synchronous>, transform_indices = @transform_2, window_bounds = array<i64: 1, 128>}, {transform_indices = @transform_3, window_bounds = array<i64: 64, 128>}]} {
    %c0 = arith.constant 0 : index
    %c0_0 = arith.constant 0 : index
    %c0_1 = arith.constant 0 : index
    %0 = vector.load %arg1[%c0, %c0_0, %c0_1] : memref<4x64x36xf32, #tpu.memory_space<vmem>>, vector<4x64x36xf32>
    %1 = vector.shape_cast %0 : vector<4x64x36xf32> to vector<256x36xf32>
    %c0_2 = arith.constant 0 : index
    %c0_3 = arith.constant 0 : index
    %2 = vector.load %arg2[%c0_2, %c0_3] : memref<36x128xf32, #tpu.memory_space<vmem>>, vector<36x128xf32>
    %cst = arith.constant dense<0.000000e+00> : vector<256x128xf32>
    %3 = tpu.matmul %1, %2, %cst {dimension_numbers = #tpu.dot_dimension_numbers<[1], [0], [0], [1], [0, 0, 1, 1], [], []>} : vector<256x36xf32>, vector<36x128xf32>, vector<256x128xf32> -> vector<256x128xf32>
    %4 = vector.shape_cast %3 : vector<256x128xf32> to vector<4x64x128xf32>
    %cst_4 = arith.constant dense<0xFF800000> : vector<64x128xf32>
    %5 = vector.multi_reduction <maximumf>, %4, %cst_4 [0] : vector<4x64x128xf32> to vector<64x128xf32>
    %c0_5 = arith.constant 0 : index
    %c0_6 = arith.constant 0 : index
    %6 = vector.load %arg3[%c0_5, %c0_6] : memref<1x128xf32, #tpu.memory_space<vmem>>, vector<1x128xf32>
    %7 = vector.broadcast %6 : vector<1x128xf32> to vector<64x128xf32>
    %8 = arith.addf %5, %7 : vector<64x128xf32>
    %cst_7 = arith.constant 0.000000e+00 : f32
    %9 = vector.broadcast %cst_7 : f32 to vector<64x128xf32>
    %10 = arith.maximumf %8, %9 : vector<64x128xf32>
    %c0_8 = arith.constant 0 : index
    %c0_9 = arith.constant 0 : index
    %11 = vector.load %arg4[%c0_8, %c0_9] : memref<64x128xf32, #tpu.memory_space<vmem>>, vector<64x128xf32>
    tpu.vector_store %arg4[%c0_8, %c0_9], %10 {strides = array<i32>} : memref<64x128xf32, #tpu.memory_space<vmem>>, vector<64x128xf32>,
    return
  }
  func.func @transform_0(%arg0: i32) -> (i32, i32, i32) {
    %c0_i32 = arith.constant 0 : i32
    %c0_i32_0 = arith.constant 0 : i32
    %c0_i32_1 = arith.constant 0 : i32
    return %c0_i32, %arg0, %c0_i32_0 : i32, i32, i32
  }
  func.func @transform_1(%arg0: i32) -> (i32, i32) {
    %c0_i32 = arith.constant 0 : i32
    %c0_i32_0 = arith.constant 0 : i32
    %c0_i32_1 = arith.constant 0 : i32
    return %c0_i32, %c0_i32_0 : i32, i32
  }
  func.func @transform_2(%arg0: i32) -> (i32, i32) {
    %c0_i32 = arith.constant 0 : i32
    %c0_i32_0 = arith.constant 0 : i32
    %c0_i32_1 = arith.constant 0 : i32
    return %c0_i32, %c0_i32_0 : i32, i32
  }
  func.func @transform_3(%arg0: i32) -> (i32, i32) {
    %c0_i32 = arith.constant 0 : i32
    %c0_i32_0 = arith.constant 0 : i32
    return %arg0, %c0_i32 : i32, i32
  }
}

module attributes {stable_mosaic.version = 11 : i64} {
  func.func @_conv_pool_relu_kernel(%arg0: i32, %arg1: memref<4x16x72xf32, #tpu.memory_space<vmem>>, %arg2: memref<72x128xf32, #tpu.memory_space<vmem>>, %arg3: memref<1x128xf32, #tpu.memory_space<vmem>>, %arg4: memref<16x128xf32, #tpu.memory_space<vmem>>) attributes {dimension_semantics = [#tpu.dimension_semantics<parallel>], iteration_bounds = array<i64: 1>, scalar_prefetch = 0 : i64, scratch_operands = 0 : i64, tpu.core_type = #tpu.core_type<tc>, window_params = [{transform_indices = @transform_0, window_bounds = array<i64: 4, 16, 72>}, {pipeline_mode = #tpu.pipeline_mode<synchronous>, transform_indices = @transform_1, window_bounds = array<i64: 72, 128>}, {pipeline_mode = #tpu.pipeline_mode<synchronous>, transform_indices = @transform_2, window_bounds = array<i64: 1, 128>}, {transform_indices = @transform_3, window_bounds = array<i64: 16, 128>}]} {
    %c0 = arith.constant 0 : index
    %c0_0 = arith.constant 0 : index
    %c0_1 = arith.constant 0 : index
    %0 = vector.load %arg1[%c0, %c0_0, %c0_1] : memref<4x16x72xf32, #tpu.memory_space<vmem>>, vector<4x16x72xf32>
    %1 = vector.shape_cast %0 : vector<4x16x72xf32> to vector<64x72xf32>
    %c0_2 = arith.constant 0 : index
    %c0_3 = arith.constant 0 : index
    %2 = vector.load %arg2[%c0_2, %c0_3] : memref<72x128xf32, #tpu.memory_space<vmem>>, vector<72x128xf32>
    %cst = arith.constant dense<0.000000e+00> : vector<64x128xf32>
    %3 = tpu.matmul %1, %2, %cst {dimension_numbers = #tpu.dot_dimension_numbers<[1], [0], [0], [1], [0, 0, 1, 1], [], []>} : vector<64x72xf32>, vector<72x128xf32>, vector<64x128xf32> -> vector<64x128xf32>
    %4 = vector.shape_cast %3 : vector<64x128xf32> to vector<4x16x128xf32>
    %cst_4 = arith.constant dense<0xFF800000> : vector<16x128xf32>
    %5 = vector.multi_reduction <maximumf>, %4, %cst_4 [0] : vector<4x16x128xf32> to vector<16x128xf32>
    %c0_5 = arith.constant 0 : index
    %c0_6 = arith.constant 0 : index
    %6 = vector.load %arg3[%c0_5, %c0_6] : memref<1x128xf32, #tpu.memory_space<vmem>>, vector<1x128xf32>
    %7 = vector.broadcast %6 : vector<1x128xf32> to vector<16x128xf32>
    %8 = arith.addf %5, %7 : vector<16x128xf32>
    %cst_7 = arith.constant 0.000000e+00 : f32
    %9 = vector.broadcast %cst_7 : f32 to vector<16x128xf32>
    %10 = arith.maximumf %8, %9 : vector<16x128xf32>
    %c0_8 = arith.constant 0 : index
    %c0_9 = arith.constant 0 : index
    %11 = vector.load %arg4[%c0_8, %c0_9] : memref<16x128xf32, #tpu.memory_space<vmem>>, vector<16x128xf32>
    tpu.vector_store %arg4[%c0_8, %c0_9], %10 {strides = array<i32>} : memref<16x128xf32, #tpu.memory_space<vmem>>, vector<16x128xf32>,
    return
  }
  func.func @transform_0(%arg0: i32) -> (i32, i32, i32) {
    %c0_i32 = arith.constant 0 : i32
    %c0_i32_0 = arith.constant 0 : i32
    %c0_i32_1 = arith.constant 0 : i32
    return %c0_i32, %arg0, %c0_i32_0 : i32, i32, i32
  }
  func.func @transform_1(%arg0: i32) -> (i32, i32) {
    %c0_i32 = arith.constant 0 : i32
    %c0_i32_0 = arith.constant 0 : i32
    %c0_i32_1 = arith.constant 0 : i32
    return %c0_i32, %c0_i32_0 : i32, i32
  }
  func.func @transform_2(%arg0: i32) -> (i32, i32) {
    %c0_i32 = arith.constant 0 : i32
    %c0_i32_0 = arith.constant 0 : i32
    %c0_i32_1 = arith.constant 0 : i32
    return %c0_i32, %c0_i32_0 : i32, i32
  }
  func.func @transform_3(%arg0: i32) -> (i32, i32) {
    %c0_i32 = arith.constant 0 : i32
    %c0_i32_0 = arith.constant 0 : i32
    return %arg0, %c0_i32 : i32, i32
  }
}

module attributes {stable_mosaic.version = 11 : i64} {
  func.func @_fc_head_kernel(%arg0: memref<16x128xf32, #tpu.memory_space<vmem>>, %arg1: memref<128x128xf32, #tpu.memory_space<vmem>>, %arg2: memref<1x128xf32, #tpu.memory_space<vmem>>, %arg3: memref<128x128xf32, #tpu.memory_space<vmem>>, %arg4: memref<1x128xf32, #tpu.memory_space<vmem>>, %arg5: memref<16x128xf32, #tpu.memory_space<vmem>>) attributes {dimension_semantics = [], scalar_prefetch = 0 : i64, scratch_operands = 0 : i64, tpu.core_type = #tpu.core_type<tc>} {
    %c0 = arith.constant 0 : index
    %c0_0 = arith.constant 0 : index
    %0 = vector.load %arg0[%c0, %c0_0] : memref<16x128xf32, #tpu.memory_space<vmem>>, vector<16x128xf32>
    %c0_1 = arith.constant 0 : index
    %c0_2 = arith.constant 0 : index
    %1 = vector.load %arg1[%c0_1, %c0_2] : memref<128x128xf32, #tpu.memory_space<vmem>>, vector<128x128xf32>
    %c0_3 = arith.constant 0 : index
    %c0_4 = arith.constant 0 : index
    %2 = vector.load %arg2[%c0_3, %c0_4] : memref<1x128xf32, #tpu.memory_space<vmem>>, vector<1x128xf32>
    %cst = arith.constant dense<0.000000e+00> : vector<16x128xf32>
    %3 = tpu.matmul %0, %1, %cst {dimension_numbers = #tpu.dot_dimension_numbers<[1], [0], [0], [1], [0, 0, 1, 1], [], []>} : vector<16x128xf32>, vector<128x128xf32>, vector<16x128xf32> -> vector<16x128xf32>
    %4 = vector.broadcast %2 : vector<1x128xf32> to vector<16x128xf32>
    %5 = arith.addf %3, %4 : vector<16x128xf32>
    %cst_5 = arith.constant 0.000000e+00 : f32
    %6 = vector.broadcast %cst_5 : f32 to vector<16x128xf32>
    %7 = arith.maximumf %5, %6 : vector<16x128xf32>
    %c0_6 = arith.constant 0 : index
    %c0_7 = arith.constant 0 : index
    %8 = vector.load %arg3[%c0_6, %c0_7] : memref<128x128xf32, #tpu.memory_space<vmem>>, vector<128x128xf32>
    %c0_8 = arith.constant 0 : index
    %c0_9 = arith.constant 0 : index
    %9 = vector.load %arg4[%c0_8, %c0_9] : memref<1x128xf32, #tpu.memory_space<vmem>>, vector<1x128xf32>
    %cst_10 = arith.constant dense<0.000000e+00> : vector<16x128xf32>
    %10 = tpu.matmul %7, %8, %cst_10 {dimension_numbers = #tpu.dot_dimension_numbers<[1], [0], [0], [1], [0, 0, 1, 1], [], []>} : vector<16x128xf32>, vector<128x128xf32>, vector<16x128xf32> -> vector<16x128xf32>
    %11 = vector.broadcast %9 : vector<1x128xf32> to vector<16x128xf32>
    %12 = arith.addf %10, %11 : vector<16x128xf32>
    %c0_11 = arith.constant 0 : index
    %c0_12 = arith.constant 0 : index
    %13 = vector.load %arg5[%c0_11, %c0_12] : memref<16x128xf32, #tpu.memory_space<vmem>>, vector<16x128xf32>
    tpu.vector_store %arg5[%c0_11, %c0_12], %12 {strides = array<i32>} : memref<16x128xf32, #tpu.memory_space<vmem>>, vector<16x128xf32>,
    return
  }
}

</mosaic_0001>

<bundles_post_ra>
// kernel: simple_cnn_forward.3
= control target key start
LH: loop header
LB: loop body
LE: loop exit
PB: predicated region body
PF: predicated region fallthrough
CT: control target
= control target key end

     0   :  { %s1037_s12 = smov 0   ;;  %s1039_s13 = smov 0   ;;  %s1251_s0 = inlined_call_operand.vmem [shape: f32[4,128,36], index: 0, kind: input, shape index: {}]   ;;  %s1252_s1 = inlined_call_operand.vmem [shape: f32[36,128], index: 1, kind: input, shape index: {}]   ;;  %s1253_s2 = inlined_call_operand.vmem [shape: f32[1,128], index: 2, kind: input, shape index: {}]   ;;  %s1254_s3 = inlined_call_operand.vmem [shape: f32[128,128], index: 3, kind: output, shape index: {}]  }
   0x1   :  { %s1041_s14 = smov 0  }
   0x2 LB: > { %s812_s15 = sadd.s32 4294967295, %s1015_s14   ;;  %s1054_s16 = sadd.s32 1, %s1015_s14   ;;  %s1015_s14 = sphi %s1041_s14, %s1257_s14   ;;  %s1011_s13 = sphi %s1039_s13, %s1256_s13   ;;  %s1007_s12 = sphi %s1037_s12, %s1255_s12  }
   0x3   : > { %s17_s17 = ssub.s32 %s1015_s14, %s1054_s16  ;;  %s20_s18 = sadd.s32 1, %s1011_s13 }
   0x4   : > { %p18_p0 = scmp.eq.s32.totalorder %s17_s17, 0  ;;  %p27_p1 = scmp.ne.s32.totalorder %s1011_s13, %s1007_s12 }
   0x5   : > { %p28_p2 = scmp.eq.s32.totalorder %s1015_s14, 0  ;;  %p815_p4 = scmp.ge.s32.totalorder %s1015_s14, 2 }
   0x6   : > { %s1063_s19 = scalar_select %p18_p0, %s1011_s13, %s20_s18  }
   0x7   : > { %p29_p3 = por %p28_p2, %p27_p1  ;;  %127 = sbr.rel (%p815_p4) target bundleno = 34 (0x22), region = 24 }
   0xe   : > { %130 = sbr.rel (!%p29_p3) target bundleno = 34 (0x22), region = 28  ;;  %s132_s20 = sand.u32 (%p29_p3), 1, %s1011_s13  }
   0xf   : > { %s859_s21 = sshll.u32 (%p29_p3), %s1015_s14, 6  ;;  %s816_s22 = sshll.u32 (%p29_p3), %s132_s20, 8 }
  0x10   : > { %s1071_s25 = scalar_lea.vmem (%p29_p3), %s1251_s0, %s859_s21  ;;  %s1076_s26 = scalar_lea.vmem (%p29_p3), [#allocation2], %s816_s22 }
  0x11   : > { %v227_v0 = vld [vmem:[%s1071_s25] sm:$0xff] (%p29_p3)  ;;  %v229_v1 = vld [vmem:[%s1071_s25 + $0x8] sm:$0xff] (%p29_p3)  ;;  %v231_v2 = vld [vmem:[%s1071_s25 + $0x10] sm:$0xff] (%p29_p3) }
  0x12   : > { %228 = vst [vmem:[%s1076_s26] sm:$0xff] (%p29_p3), %v227_v0  ;;  %230 = vst [vmem:[%s1076_s26 + $0x8] sm:$0xff] (%p29_p3), %v229_v1  ;;  %v233_v3 = vld [vmem:[%s1071_s25 + $0x18] sm:$0xff] (%p29_p3)  ;;  %v235_v4 = vld [vmem:[%s1071_s25 + $0x20] sm:$0xff] (%p29_p3) }
  0x13   : > { %232 = vst [vmem:[%s1076_s26 + $0x10] sm:$0xff] (%p29_p3), %v231_v2  ;;  %v237_v5 = vld [vmem:[%s1071_s25 + $0x28] sm:$0xff] (%p29_p3)  ;;  %234 = vst [vmem:[%s1076_s26 + $0x18] sm:$0xff] (%p29_p3), %v233_v3  ;;  %v239_v6 = vld [vmem:[%s1071_s25 + $0x30] sm:$0xff] (%p29_p3) }
  0x14   : > { %236 = vst [vmem:[%s1076_s26 + $0x20] sm:$0xff] (%p29_p3), %v235_v4  ;;  %238 = vst [vmem:[%s1076_s26 + $0x28] sm:$0xff] (%p29_p3), %v237_v5  ;;  %v241_v7 = vld [vmem:[%s1071_s25 + $0x38] sm:$0xff] (%p29_p3)  ;;  %v243_v8 = vld [vmem:[%s1071_s25 + $0x80] sm:$0xff] (%p29_p3) }
  0x15   : > { %240 = vst [vmem:[%s1076_s26 + $0x30] sm:$0xff] %v239_v6  ;;  %242 = vst [vmem:[%s1076_s26 + $0x38] sm:$0xff] %v241_v7  ;;  %v245_v9 = vld [vmem:[%s1071_s25 + $0x88] sm:$0xff]  ;;  %v247_v10 = vld [vmem:[%s1071_s25 + $0x90] sm:$0xff] }
  0x16   : > { %244 = vst [vmem:[%s1076_s26 + $0x40] sm:$0xff] %v243_v8  ;;  %v249_v11 = vld [vmem:[%s1071_s25 + $0x98] sm:$0xff]  ;;  %246 = vst [vmem:[%s1076_s26 + $0x48] sm:$0xff] %v245_v9  ;;  %v251_v12 = vld [vmem:[%s1071_s25 + $0xa0] sm:$0xff] }
  0x17   : > { %248 = vst [vmem:[%s1076_s26 + $0x50] sm:$0xff] %v247_v10  ;;  %250 = vst [vmem:[%s1076_s26 + $0x58] sm:$0xff] %v249_v11  ;;  %v253_v13 = vld [vmem:[%s1071_s25 + $0xa8] sm:$0xff]  ;;  %v255_v14 = vld [vmem:[%s1071_s25 + $0xb0] sm:$0xff] }
  0x18   : > { %252 = vst [vmem:[%s1076_s26 + $0x60] sm:$0xff] %v251_v12  ;;  %254 = vst [vmem:[%s1076_s26 + $0x68] sm:$0xff] %v253_v13  ;;  %v257_v15 = vld [vmem:[%s1071_s25 + $0xb8] sm:$0xff]  ;;  %v259_v16 = vld [vmem:[%s1071_s25 + $0x100] sm:$0xff] }
  0x19   : > { %256 = vst [vmem:[%s1076_s26 + $0x70] sm:$0xff] %v255_v14  ;;  %v261_v17 = vld [vmem:[%s1071_s25 + $0x108] sm:$0xff]  ;;  %258 = vst [vmem:[%s1076_s26 + $0x78] sm:$0xff] %v257_v15  ;;  %v263_v18 = vld [vmem:[%s1071_s25 + $0x110] sm:$0xff] }
  0x1a   : > { %260 = vst [vmem:[%s1076_s26 + $0x80] sm:$0xff] %v259_v16  ;;  %262 = vst [vmem:[%s1076_s26 + $0x88] sm:$0xff] %v261_v17  ;;  %v265_v19 = vld [vmem:[%s1071_s25 + $0x118] sm:$0xff]  ;;  %v267_v20 = vld [vmem:[%s1071_s25 + $0x120] sm:$0xff] }
  0x1b   : > { %264 = vst [vmem:[%s1076_s26 + $0x90] sm:$0xff] %v263_v18  ;;  %266 = vst [vmem:[%s1076_s26 + $0x98] sm:$0xff] %v265_v19  ;;  %v269_v21 = vld [vmem:[%s1071_s25 + $0x128] sm:$0xff]  ;;  %v271_v22 = vld [vmem:[%s1071_s25 + $0x130] sm:$0xff] }
  0x1c   : > { %268 = vst [vmem:[%s1076_s26 + $0xa0] sm:$0xff] %v267_v20  ;;  %v273_v23 = vld [vmem:[%s1071_s25 + $0x138] sm:$0xff]  ;;  %270 = vst [vmem:[%s1076_s26 + $0xa8] sm:$0xff] %v269_v21  ;;  %v275_v24 = vld [vmem:[%s1071_s25 + $0x180] sm:$0xff] }
  0x1d   : > { %272 = vst [vmem:[%s1076_s26 + $0xb0] sm:$0xff] %v271_v22  ;;  %274 = vst [vmem:[%s1076_s26 + $0xb8] sm:$0xff] %v273_v23  ;;  %v277_v25 = vld [vmem:[%s1071_s25 + $0x188] sm:$0xff]  ;;  %v279_v26 = vld [vmem:[%s1071_s25 + $0x190] sm:$0xff] }
  0x1e   : > { %276 = vst [vmem:[%s1076_s26 + $0xc0] sm:$0xff] %v275_v24  ;;  %278 = vst [vmem:[%s1076_s26 + $0xc8] sm:$0xff] %v277_v25  ;;  %v281_v27 = vld [vmem:[%s1071_s25 + $0x198] sm:$0xff]  ;;  %v283_v28 = vld [vmem:[%s1071_s25 + $0x1a0] sm:$0xff] }
  0x1f   : > { %280 = vst [vmem:[%s1076_s26 + $0xd0] sm:$0xff] %v279_v26  ;;  %v285_v29 = vld [vmem:[%s1071_s25 + $0x1a8] sm:$0xff]  ;;  %282 = vst [vmem:[%s1076_s26 + $0xd8] sm:$0xff] %v281_v27  ;;  %v287_v30 = vld [vmem:[%s1071_s25 + $0x1b0] sm:$0xff] }
  0x20   : > { %284 = vst [vmem:[%s1076_s26 + $0xe0] sm:$0xff] %v283_v28  ;;  %286 = vst [vmem:[%s1076_s26 + $0xe8] sm:$0xff] %v285_v29  ;;  %v289_v31 = vld [vmem:[%s1071_s25 + $0x1b8] sm:$0xff] }
  0x21   : > { %288 = vst [vmem:[%s1076_s26 + $0xf0] sm:$0xff] %v287_v30  ;;  %290 = vst [vmem:[%s1076_s26 + $0xf8] sm:$0xff] %v289_v31 }
  0x22 PF: > { %p819_p5 = scmp.ge.s32.totalorder %s1015_s14, 1  ;;  %p295_p6 = scmp.lt.s32.totalorder %s1015_s14, 3 }
  0x24   : > { %p296_p7 = pnand %p819_p5, %p295_p6 }
  0x25   : > { %v364_v32 = vld [vmem:[%s1252_s1] sm:$0xff] (!%p296_p7)  ;;  %v365_v33 = vld [vmem:[%s1252_s1 + $0x8] sm:$0xff] (!%p296_p7)  ;;  %v366_v34 = vld [vmem:[%s1252_s1 + $0x10] sm:$0xff] (!%p296_p7)  ;;  %s302_s6 = sand.u32 (!%p296_p7), 1, %s1007_s12   ;;  %vm369_vm0 = vcmask (!%p296_p7), 293888   ;;  %vm466_vm1 = vcmask (!%p296_p7), 1043456  }
  0x26   : > { %299 = sbr.rel (%p296_p7) target bundleno = 302 (0x12e), region = 66  ;;  %v955_v35 = vpack.c.bf16 (!%p296_p7), %v365_v33, %v364_v32  ;;  %v367_v36 = vld [vmem:[%s1252_s1 + $0x18] sm:$0xff] (!%p296_p7)  ;;  %s820_s9 = sshll.u32 (!%p296_p7), %s302_s6, 8  ;;  %v368_v40 = vld [vmem:[%s1252_s1 + $0x20] sm:$0xf] (!%p296_p7) }
  0x27   : > { %v959_v37 = vpack.c.bf16 (!%p296_p7), %v367_v36, %v366_v34  ;;  %s1154_s10 = scalar_lea.vmem (!%p296_p7), [#allocation2], %s820_s9  ;;  %s821_s17 = sshll.u32 (!%p296_p7), %s812_s15, 3  ;;  %v856_v30 = vld [vmem:[%s1253_s2] ss:$0 sm:$0xff] (!%p296_p7) }
  0x28   : > { %956 = vmatprep.subr.bf16.mxu0 (!%p296_p7), %v955_v35  ;;  %963 = vmatprep.subr.bf16.mxu1 (!%p296_p7), %v955_v35  ;;  %v332_v38 = vld [vmem:[%s1154_s10] sm:$0xff] (!%p296_p7)  ;;  %v333_v41 = vld [vmem:[%s1154_s10 + $0x8] sm:$0xff] (!%p296_p7)  ;;  %v334_v43 = vld [vmem:[%s1154_s10 + $0x10] sm:$0xff] (!%p296_p7)  ;;  %p327_p8 = scmp.lt.s32.totalorder (!%p296_p7), %s821_s17, 15 }
  0x29   : > { %v348_v39 = vld [vmem:[%s1154_s10 + $0x80] sm:$0xff] (!%p296_p7)  ;;  %958 = vmatpush3.bf16.msra.mxu0 (!%p296_p7), %v955_v35  ;;  %966 = vmatpush3.bf16.msra.mxu1 (!%p296_p7), %v955_v35  ;;  %v349_v42 = vld [vmem:[%s1154_s10 + $0x88] sm:$0xff] (!%p296_p7)  ;;  %v350_v44 = vld [vmem:[%s1154_s10 + $0x90] sm:$0xff] (!%p296_p7) }
  0x2a   : > { %960 = vmatprep.subr.bf16.mxu0 (!%p296_p7), %v959_v37  ;;  %964 = vmatprep.subr.bf16.mxu1 (!%p296_p7), %v959_v37  ;;  %v335_v45 = vld [vmem:[%s1154_s10 + $0x18] sm:$0xff] (!%p296_p7)  ;;  %v336_v47 = vld [vmem:[%s1154_s10 + $0x20] sm:$0xff] (!%p296_p7)  ;;  %v337_v49 = vld [vmem:[%s1154_s10 + $0x28] sm:$0xff] (!%p296_p7) }
  0x2b   : > { %907 = vmatprep.mubr.msk.f32.mxu0 (!%p296_p7), %vm369_vm0, %v332_v38  ;;  %931 = vmatprep.mubr.msk.f32.mxu1 (!%p296_p7), %vm369_vm0, %v348_v39  ;;  %v351_v46 = vld [vmem:[%s1154_s10 + $0x98] sm:$0xff] (!%p296_p7)  ;;  %v352_v48 = vld [vmem:[%s1154_s10 + $0xa0] sm:$0xff] (!%p296_p7)  ;;  %v353_v50 = vld [vmem:[%s1154_s10 + $0xa8] sm:$0xff] (!%p296_p7) }
  0x2c   : > { %v338_v51 = vld [vmem:[%s1154_s10 + $0x30] sm:$0xff] (!%p296_p7)  ;;  %v339_v53 = vld [vmem:[%s1154_s10 + $0x38] sm:$0xff] (!%p296_p7)  ;;  %v340_v55 = vld [vmem:[%s1154_s10 + $0x40] sm:$0xff] (!%p296_p7) }
  0x2d   : > { %962 = vmatpush3.bf16.msra.mxu0 %v959_v37  ;;  %967 = vmatpush3.bf16.msra.mxu1 %v959_v37  ;;  %v354_v52 = vld [vmem:[%s1154_s10 + $0xb0] sm:$0xff]  ;;  %v355_v54 = vld [vmem:[%s1154_s10 + $0xb8] sm:$0xff]  ;;  %v356_v56 = vld [vmem:[%s1154_s10 + $0xc0] sm:$0xff]  ;;  %s1259_s17 = smov (!%p327_p8, %s821_s17), 15 }
  0x2e   : > { %905 = vmatprep.subr.msk.mxu0 %vm466_vm1, %v368_v40  ;;  %965 = vmatprep.subr.msk.mxu1 %vm466_vm1, %v368_v40  ;;  %v341_v57 = vld [vmem:[%s1154_s10 + $0x48] sm:$0xff]  ;;  %v342_v59 = vld [vmem:[%s1154_s10 + $0x50] sm:$0xff]  ;;  %v343_v61 = vld [vmem:[%s1154_s10 + $0x58] sm:$0xff]  ;;  %s822_s14 = sshll.u32 %s1259_s17, 3 }
  0x2f   : > { %v357_v58 = vld [vmem:[%s1154_s10 + $0xc8] sm:$0xff]  ;;  %v358_v60 = vld [vmem:[%s1154_s10 + $0xd0] sm:$0xff]  ;;  %v359_v62 = vld [vmem:[%s1154_s10 + $0xd8] sm:$0xff]  ;;  %s1231_s22 = scalar_lea.vmem %s1254_s3, %s822_s14 }
  0x30   : > { %v344_v63 = vld [vmem:[%s1154_s10 + $0x60] sm:$0xff]  ;;  %v345_v1 = vld [vmem:[%s1154_s10 + $0x68] sm:$0xff]  ;;  %v346_v3 = vld [vmem:[%s1154_s10 + $0x70] sm:$0xff] }
  0x31   : > { %906 = vmatpush3.msk.msra.mxu0 %vm466_vm1, %v368_v40  ;;  %968 = vmatpush3.msk.msra.mxu1 %vm466_vm1, %v368_v40  ;;  %v360_v0 = vld [vmem:[%s1154_s10 + $0xe0] sm:$0xff]  ;;  %v361_v2 = vld [vmem:[%s1154_s10 + $0xe8] sm:$0xff]  ;;  %v362_v4 = vld [vmem:[%s1154_s10 + $0xf0] sm:$0xff] }
  0x32   : > { %908 = vmatmul.mubr.msk.f32.vlgmr.msra.gmra.mrb[0].mxu0 %vm369_vm0, %v333_v41  ;;  %932 = vmatmul.mubr.msk.f32.vlgmr.msra.gmra.mrb[0].mxu1 %vm369_vm0, %v349_v42  ;;  %v347_v5 = vld [vmem:[%s1154_s10 + $0x78] sm:$0xff] }
  0x33   : > { %910 = vmatprep.mubr.msk.f32.mxu0 %vm369_vm0, %v334_v43  ;;  %934 = vmatprep.mubr.msk.f32.mxu1 %vm369_vm0, %v350_v44  ;;  %v363_v6 = vld [vmem:[%s1154_s10 + $0xf8] sm:$0xff] }
  0x36   : > { %911 = vmatmul.mubr.msk.f32.gmra.mrb[2].mxu0 %vm369_vm0, %v335_v45  ;;  %935 = vmatmul.mubr.msk.f32.gmra.mrb[2].mxu1 %vm369_vm0, %v351_v46 }
  0x37   : > { %913 = vmatprep.mubr.msk.f32.mxu0 %vm369_vm0, %v336_v47  ;;  %937 = vmatprep.mubr.msk.f32.mxu1 %vm369_vm0, %v352_v48 }
  0x3a   : > { %914 = vmatmul.mubr.msk.f32.gmra.mrb[4].mxu0 %vm369_vm0, %v337_v49  ;;  %938 = vmatmul.mubr.msk.f32.gmra.mrb[4].mxu1 %vm369_vm0, %v353_v50 }
  0x3b   : > { %916 = vmatprep.mubr.msk.f32.mxu0 %vm369_vm0, %v338_v51  ;;  %940 = vmatprep.mubr.msk.f32.mxu1 %vm369_vm0, %v354_v52 }
  0x3e   : > { %917 = vmatmul.mubr.msk.f32.gmra.mrb[6].mxu0 %vm369_vm0, %v339_v53  ;;  %941 = vmatmul.mubr.msk.f32.gmra.mrb[6].mxu1 %vm369_vm0, %v355_v54 }
  0x3f   : > { %919 = vmatprep.mubr.msk.f32.mxu0 %vm369_vm0, %v340_v55  ;;  %943 = vmatprep.mubr.msk.f32.mxu1 %vm369_vm0, %v356_v56 }
  0x42   : > { %920 = vmatmul.mubr.msk.f32.gmra.mrb[8].mxu0 %vm369_vm0, %v341_v57  ;;  %944 = vmatmul.mubr.msk.f32.gmra.mrb[8].mxu1 %vm369_vm0, %v357_v58 }
  0x43   : > { %922 = vmatprep.mubr.msk.f32.mxu0 %vm369_vm0, %v342_v59  ;;  %946 = vmatprep.mubr.msk.f32.mxu1 %vm369_vm0, %v358_v60 }
  0x46   : > { %923 = vmatmul.mubr.msk.f32.gmra.mrb[10].mxu0 %vm369_vm0, %v343_v61  ;;  %947 = vmatmul.mubr.msk.f32.gmra.mrb[10].mxu1 %vm369_vm0, %v359_v62 }
  0x47   : > { %925 = vmatprep.mubr.msk.f32.mxu0 %vm369_vm0, %v344_v63  ;;  %949 = vmatprep.mubr.msk.f32.mxu1 %vm369_vm0, %v360_v0 }
  0x4a   : > { %926 = vmatmul.mubr.msk.f32.gmra.mrb[12].mxu0 %vm369_vm0, %v345_v1  ;;  %950 = vmatmul.mubr.msk.f32.gmra.mrb[12].mxu1 %vm369_vm0, %v361_v2 }
  0x4b   : > { %928 = vmatprep.mubr.msk.f32.mxu0 %vm369_vm0, %v346_v3  ;;  %952 = vmatprep.mubr.msk.f32.mxu1 %vm369_vm0, %v362_v4 }
  0x4e   : > { %929 = vmatmul.mubr.msk.f32.gmra.mrb[14].mxu0 %vm369_vm0, %v347_v5  ;;  %953 = vmatmul.mubr.msk.f32.gmra.mrb[14].mxu1 %vm369_vm0, %v363_v6 }
 0x105   : > { %v909_v7 = vpop.f32.mrb[0].mxu0  ;;  %v933_v8 = vpop.f32.mrb[0].mxu1 }
 0x106   : > { %v536_v9 = vpop.f32.mrb[1].mxu0  ;;  %v616_v10 = vpop.f32.mrb[1].mxu1 }
 0x109   : > { %v912_v11 = vpop.f32.mrb[2].mxu0  ;;  %v936_v12 = vpop.f32.mrb[2].mxu1 }
 0x10a   : > { %v546_v13 = vpop.f32.mrb[3].mxu0  ;;  %v626_v14 = vpop.f32.mrb[3].mxu1 }
 0x10d   : > { %v915_v15 = vpop.f32.mrb[4].mxu0  ;;  %v939_v16 = vpop.f32.mrb[4].mxu1 }
 0x10e   : > { %v556_v17 = vpop.f32.mrb[5].mxu0  ;;  %v636_v18 = vpop.f32.mrb[5].mxu1 }
 0x111   : > { %v918_v19 = vpop.f32.mrb[6].mxu0  ;;  %v942_v20 = vpop.f32.mrb[6].mxu1 }
 0x112   : > { %v566_v21 = vpop.f32.mrb[7].mxu0  ;;  %v646_v22 = vpop.f32.mrb[7].mxu1 }
 0x115   : > { %v921_v23 = vpop.f32.mrb[8].mxu0  ;;  %v945_v24 = vpop.f32.mrb[8].mxu1 }
 0x116   : > { %v698_v25 = vmax.f32 %v909_v7, %v921_v23  ;;  %v576_v26 = vpop.f32.mrb[9].mxu0  ;;  %v656_v27 = vpop.f32.mrb[9].mxu1 }
 0x117   : > { %v695_v28 = vmax.f32 %v536_v9, %v576_v26 }
 0x118   : > { %v699_v29 = vmax.f32 %v698_v25, %v933_v8 }
 0x119   : > { %v924_v31 = vpop.f32.mrb[10].mxu0  ;;  %v696_v32 = vmax.f32 %v695_v28, %v616_v10  ;;  %v948_v33 = vpop.f32.mrb[10].mxu1 }
 0x11a   : > { %v700_v34 = vmax.f32 %v699_v29, %v945_v24  ;;  %v704_v35 = vmax.f32 %v912_v11, %v924_v31  ;;  %v586_v36 = vpop.f32.mrb[11].mxu0  ;;  %v666_v37 = vpop.f32.mrb[11].mxu1 }
 0x11b   : > { %v697_v38 = vmax.f32 %v696_v32, %v656_v27  ;;  %v701_v39 = vmax.f32 %v546_v13, %v586_v36 }
 0x11c   : > { %v727_v40 = vadd.f32 %v856_v30, %v700_v34  ;;  %v705_v41 = vmax.f32 %v704_v35, %v936_v12 }
 0x11d   : > { %v726_v42 = vadd.f32 %v856_v30, %v697_v38  ;;  %v927_v43 = vpop.f32.mrb[12].mxu0  ;;  %v702_v44 = vmax.f32 %v701_v39, %v626_v14  ;;  %v951_v45 = vpop.f32.mrb[12].mxu1 }
 0x11e   : > { %v735_v46 = vmax.f32 %v727_v40, 0.0  ;;  %v706_v47 = vmax.f32 %v705_v41, %v948_v33  ;;  %v710_v48 = vmax.f32 %v915_v15, %v927_v43  ;;  %v596_v49 = vpop.f32.mrb[13].mxu0  ;;  %v676_v50 = vpop.f32.mrb[13].mxu1 }
 0x11f   : > { %v734_v51 = vmax.f32 %v726_v42, 0.0  ;;  %v703_v52 = vmax.f32 %v702_v44, %v666_v37  ;;  %v707_v53 = vmax.f32 %v556_v17, %v596_v49 }
 0x120   : > { %743 = vst [vmem:[%s1231_s22 + $0x8] sm:$0xff] %v735_v46  ;;  %v729_v54 = vadd.f32 %v856_v30, %v706_v47  ;;  %v711_v55 = vmax.f32 %v710_v48, %v939_v16 }
 0x121   : > { %742 = vst [vmem:[%s1231_s22] sm:$0xff] %v734_v51  ;;  %v728_v56 = vadd.f32 %v856_v30, %v703_v52  ;;  %v930_v57 = vpop.f32.mrb[14].mxu0  ;;  %v708_v58 = vmax.f32 %v707_v53, %v636_v18  ;;  %v954_v59 = vpop.f32.mrb[14].mxu1 }
 0x122   : > { %v737_v60 = vmax.f32 %v729_v54, 0.0  ;;  %v712_v61 = vmax.f32 %v711_v55, %v951_v45  ;;  %v716_v62 = vmax.f32 %v918_v19, %v930_v57  ;;  %v606_v63 = vpop.f32.mrb[15].mxu0  ;;  %v686_v0 = vpop.f32.mrb[15].mxu1 }
 0x123   : > { %v736_v1 = vmax.f32 %v728_v56, 0.0  ;;  %v709_v2 = vmax.f32 %v708_v58, %v676_v50  ;;  %v713_v3 = vmax.f32 %v566_v21, %v606_v63 }
 0x124   : > { %745 = vst [vmem:[%s1231_s22 + $0x18] sm:$0xff] %v737_v60  ;;  %v731_v4 = vadd.f32 %v856_v30, %v712_v61  ;;  %v717_v5 = vmax.f32 %v716_v62, %v942_v20 }
 0x125   : > { %744 = vst [vmem:[%s1231_s22 + $0x10] sm:$0xff] %v736_v1  ;;  %v730_v6 = vadd.f32 %v856_v30, %v709_v2  ;;  %v714_v7 = vmax.f32 %v713_v3, %v646_v22 }
 0x126   : > { %v739_v8 = vmax.f32 %v731_v4, 0.0  ;;  %v718_v9 = vmax.f32 %v717_v5, %v954_v59 }
 0x127   : > { %v738_v10 = vmax.f32 %v730_v6, 0.0  ;;  %v715_v11 = vmax.f32 %v714_v7, %v686_v0 }
 0x128   : > { %747 = vst [vmem:[%s1231_s22 + $0x28] sm:$0xff] %v739_v8  ;;  %v733_v12 = vadd.f32 %v856_v30, %v718_v9 }
 0x129   : > { %746 = vst [vmem:[%s1231_s22 + $0x20] sm:$0xff] %v738_v10  ;;  %v732_v13 = vadd.f32 %v856_v30, %v715_v11 }
 0x12a   : > { %v741_v14 = vmax.f32 %v733_v12, 0.0 }
 0x12b   : > { %v740_v15 = vmax.f32 %v732_v13, 0.0 }
 0x12c   : > { %749 = vst [vmem:[%s1231_s22 + $0x38] sm:$0xff] %v741_v14 }
 0x12d   : > { %748 = vst [vmem:[%s1231_s22 + $0x30] sm:$0xff] %v740_v15 }
 0x12e PF: > { %p10_p9 = scmp.ge.s32.totalorder %s1054_s16, 4   ;;  %s1255_s12 = smov %s1011_s13 }
 0x12f   : > { %s1256_s13 = smov %s1063_s19  ;;  %s1257_s14 = smov %s1054_s16 }
 0x130   :  { %12 = sbr.rel (!%p10_p9) target bundleno = 2 (0x2), region = 105 }

// kernel: simple_cnn_forward.4
= control target key start
LH: loop header
LB: loop body
LE: loop exit
PB: predicated region body
PF: predicated region fallthrough
CT: control target
= control target key end

     0   :  { %vm31_vm0 = vcmask 588800   ;;  %s354_s1 = inlined_call_operand.vmem [shape: f32[72,128], index: 1, kind: input, shape index: {}]   ;;  %s355_s0 = inlined_call_operand.vmem [shape: f32[4,16,72], index: 0, kind: input, shape index: {}]   ;;  %s356_s2 = inlined_call_operand.vmem [shape: f32[1,128], index: 2, kind: input, shape index: {}]   ;;  %s357_s3 = inlined_call_operand.vmem [shape: f32[16,128], index: 3, kind: output, shape index: {}]  }
   0x1   :  { %v22_v0 = vld [vmem:[%s354_s1] sm:$0xff]  ;;  %v23_v1 = vld [vmem:[%s354_s1 + $0x8] sm:$0xff]  ;;  %v24_v2 = vld [vmem:[%s354_s1 + $0x10] sm:$0xff] }
   0x2   :  { %v240_v3 = vpack.c.bf16 %v23_v1, %v22_v0  ;;  %v25_v4 = vld [vmem:[%s354_s1 + $0x18] sm:$0xff]  ;;  %v26_v6 = vld [vmem:[%s354_s1 + $0x20] sm:$0xff]  ;;  %v27_v7 = vld [vmem:[%s354_s1 + $0x28] sm:$0xff] }
   0x3   :  { %v244_v5 = vpack.c.bf16 %v25_v4, %v24_v2  ;;  %v14_v8 = vld [vmem:[%s355_s0] sm:$0xff]  ;;  %v248_v10 = vpack.c.bf16 %v27_v7, %v26_v6  ;;  %v28_v11 = vld [vmem:[%s354_s1 + $0x30] sm:$0xff]  ;;  %v29_v12 = vld [vmem:[%s354_s1 + $0x38] sm:$0xff] }
   0x4   :  { %241 = vmatprep.subr.bf16.mxu0 %v240_v3  ;;  %256 = vmatprep.subr.bf16.mxu1 %v240_v3  ;;  %v18_v9 = vld [vmem:[%s355_s0 + $0x20] sm:$0xff]  ;;  %v252_v13 = vpack.c.bf16 %v29_v12, %v28_v11  ;;  %v15_v15 = vld [vmem:[%s355_s0 + $0x8] sm:$0xff]  ;;  %v16_v17 = vld [vmem:[%s355_s0 + $0x10] sm:$0xff] }
   0x5   :  { %243 = vmatpush3.bf16.msra.mxu0 %v240_v3  ;;  %261 = vmatpush3.bf16.msra.mxu1 %v240_v3  ;;  %v30_v14 = vld [vmem:[%s354_s1 + $0x40] sm:$0xff]  ;;  %v19_v16 = vld [vmem:[%s355_s0 + $0x28] sm:$0xff]  ;;  %v20_v18 = vld [vmem:[%s355_s0 + $0x30] sm:$0xff] }
   0x6   :  { %245 = vmatprep.subr.bf16.mxu0 %v244_v5  ;;  %257 = vmatprep.subr.bf16.mxu1 %v244_v5  ;;  %v17_v19 = vld [vmem:[%s355_s0 + $0x18] sm:$0xff]  ;;  %v192_v32 = vld [vmem:[%s356_s2] ss:$0 sm:$0xff] }
   0x7   :  { %228 = vmatprep.mubr.msk.f32.mxu0 %vm31_vm0, %v14_v8  ;;  %234 = vmatprep.mubr.msk.f32.mxu1 %vm31_vm0, %v18_v9  ;;  %v21_v20 = vld [vmem:[%s355_s0 + $0x38] sm:$0xff] }
   0x9   :  { %247 = vmatpush3.bf16.msra.mxu0 %v244_v5  ;;  %262 = vmatpush3.bf16.msra.mxu1 %v244_v5 }
   0xa   :  { %249 = vmatprep.subr.bf16.mxu0 %v248_v10  ;;  %258 = vmatprep.subr.bf16.mxu1 %v248_v10 }
   0xd   :  { %251 = vmatpush3.bf16.msra.mxu0 %v248_v10  ;;  %263 = vmatpush3.bf16.msra.mxu1 %v248_v10 }
   0xe   :  { %253 = vmatprep.subr.bf16.mxu0 %v252_v13  ;;  %259 = vmatprep.subr.bf16.mxu1 %v252_v13 }
  0x11   :  { %255 = vmatpush3.bf16.msra.mxu0 %v252_v13  ;;  %264 = vmatpush3.bf16.msra.mxu1 %v252_v13 }
  0x12   :  { %226 = vmatprep.subr.mxu0 %v30_v14  ;;  %260 = vmatprep.subr.mxu1 %v30_v14 }
  0x15   :  { %227 = vmatpush3.msra.mxu0 %v30_v14  ;;  %265 = vmatpush3.msra.mxu1 %v30_v14 }
  0x16   :  { %229 = vmatmul.mubr.msk.f32.vlgmr.msra.gmra.mrb[0].mxu0 %vm31_vm0, %v15_v15  ;;  %235 = vmatmul.mubr.msk.f32.vlgmr.msra.gmra.mrb[0].mxu1 %vm31_vm0, %v19_v16 }
  0x17   :  { %231 = vmatprep.mubr.msk.f32.mxu0 %vm31_vm0, %v16_v17  ;;  %237 = vmatprep.mubr.msk.f32.mxu1 %vm31_vm0, %v20_v18 }
  0x1a   :  { %232 = vmatmul.mubr.msk.f32.gmra.mrb[2].mxu0 %vm31_vm0, %v17_v19  ;;  %238 = vmatmul.mubr.msk.f32.gmra.mrb[2].mxu1 %vm31_vm0, %v21_v20 }
  0xe9   :  { %v230_v21 = vpop.f32.mrb[0].mxu0  ;;  %v236_v22 = vpop.f32.mrb[0].mxu1 }
  0xea   :  { %v164_v23 = vmax.f32 %v230_v21, %v236_v22  ;;  %v122_v24 = vpop.f32.mrb[1].mxu0  ;;  %v142_v25 = vpop.f32.mrb[1].mxu1 }
  0xeb   :  { %v161_v26 = vmax.f32 %v122_v24, %v142_v25 }
  0xed   :  { %v233_v27 = vpop.f32.mrb[2].mxu0  ;;  %v239_v28 = vpop.f32.mrb[2].mxu1 }
  0xee   :  { %v165_v29 = vmax.f32 %v233_v27, %v239_v28  ;;  %v132_v30 = vpop.f32.mrb[3].mxu0  ;;  %v152_v31 = vpop.f32.mrb[3].mxu1 }
  0xef   :  { %v162_v33 = vmax.f32 %v132_v30, %v152_v31 }
  0xf0   :  { %v166_v34 = vmax.f32 %v164_v23, %v165_v29 }
  0xf1   :  { %v163_v35 = vmax.f32 %v161_v26, %v162_v33 }
  0xf2   :  { %v175_v36 = vadd.f32 %v192_v32, %v166_v34 }
  0xf3   :  { %v174_v37 = vadd.f32 %v192_v32, %v163_v35 }
  0xf4   :  { %v177_v38 = vmax.f32 %v175_v36, 0.0 }
  0xf5   :  { %v176_v39 = vmax.f32 %v174_v37, 0.0 }
  0xf6   :  { %179 = vst [vmem:[%s357_s3 + $0x8] sm:$0xff] %v177_v38 }
  0xf7   :  { %178 = vst [vmem:[%s357_s3] sm:$0xff] %v176_v39 }

// kernel: simple_cnn_forward.5
= control target key start
LH: loop header
LB: loop body
LE: loop exit
PB: predicated region body
PF: predicated region fallthrough
CT: control target
= control target key end

     0   :  { %s542_s1 = inlined_call_operand.vmem [shape: f32[128,128], index: 1, kind: input, shape index: {}]   ;;  %s543_s0 = inlined_call_operand.vmem [shape: f32[16,128], index: 0, kind: input, shape index: {}]   ;;  %s544_s3 = inlined_call_operand.vmem [shape: f32[128,128], index: 3, kind: input, shape index: {}]   ;;  %s545_s2 = inlined_call_operand.vmem [shape: f32[1,128], index: 2, kind: input, shape index: {}]   ;;  %s546_s4 = inlined_call_operand.vmem [shape: f32[1,128], index: 4, kind: input, shape index: {}]   ;;  %s547_s5 = inlined_call_operand.vmem [shape: f32[16,128], index: 5, kind: output, shape index: {}]  }
   0x1   :  { %v22_v0 = vld [vmem:[%s542_s1] sm:$0xff]  ;;  %v23_v1 = vld [vmem:[%s542_s1 + $0x8] sm:$0xff]  ;;  %v24_v2 = vld [vmem:[%s542_s1 + $0x10] sm:$0xff] }
   0x2   :  { %v334_v3 = vpack.c.bf16 %v23_v1, %v22_v0  ;;  %v25_v4 = vld [vmem:[%s542_s1 + $0x18] sm:$0xff]  ;;  %v26_v6 = vld [vmem:[%s542_s1 + $0x20] sm:$0xff]  ;;  %v27_v7 = vld [vmem:[%s542_s1 + $0x28] sm:$0xff] }
   0x3   :  { %v338_v5 = vpack.c.bf16 %v25_v4, %v24_v2  ;;  %v342_v8 = vpack.c.bf16 %v27_v7, %v26_v6  ;;  %v28_v9 = vld [vmem:[%s542_s1 + $0x30] sm:$0xff]  ;;  %v29_v10 = vld [vmem:[%s542_s1 + $0x38] sm:$0xff]  ;;  %v20_v11 = vld [vmem:[%s543_s0] sm:$0xff] }
   0x4   :  { %335 = vmatprep.subr.bf16.mxu0 %v334_v3  ;;  %296 = vmatprep.mubr.f32.mxu0 %v20_v11  ;;  %v122_v12 = vld [vmem:[%s544_s3] sm:$0xff]  ;;  %v123_v13 = vld [vmem:[%s544_s3 + $0x8] sm:$0xff]  ;;  %v124_v14 = vld [vmem:[%s544_s3 + $0x10] sm:$0xff]  ;;  %v346_v20 = vpack.c.bf16 %v29_v10, %v28_v9 }
   0x5   :  { %337 = vmatpush3.bf16.msra.mxu0 %v334_v3  ;;  %v366_v15 = vpack.c.bf16 %v123_v13, %v122_v12  ;;  %v125_v16 = vld [vmem:[%s544_s3 + $0x18] sm:$0xff]  ;;  %v126_v18 = vld [vmem:[%s544_s3 + $0x20] sm:$0xff]  ;;  %v127_v19 = vld [vmem:[%s544_s3 + $0x28] sm:$0xff] }
   0x6   :  { %339 = vmatprep.subr.bf16.mxu0 %v338_v5  ;;  %v370_v17 = vpack.c.bf16 %v125_v16, %v124_v14  ;;  %v30_v21 = vld [vmem:[%s542_s1 + $0x40] sm:$0xff]  ;;  %v31_v22 = vld [vmem:[%s542_s1 + $0x48] sm:$0xff]  ;;  %v374_v23 = vpack.c.bf16 %v127_v19, %v126_v18  ;;  %v128_v24 = vld [vmem:[%s544_s3 + $0x30] sm:$0xff] }
   0x7   :  { %367 = vmatprep.subr.bf16.mxu1 %v366_v15  ;;  %v129_v25 = vld [vmem:[%s544_s3 + $0x38] sm:$0xff]  ;;  %v350_v26 = vpack.c.bf16 %v31_v22, %v30_v21  ;;  %v32_v27 = vld [vmem:[%s542_s1 + $0x50] sm:$0xff]  ;;  %v130_v30 = vld [vmem:[%s544_s3 + $0x40] sm:$0xff] }
   0x8   :  { %369 = vmatpush3.bf16.msra.mxu1 %v366_v15  ;;  %v33_v28 = vld [vmem:[%s542_s1 + $0x58] sm:$0xff]  ;;  %v378_v29 = vpack.c.bf16 %v129_v25, %v128_v24  ;;  %v131_v31 = vld [vmem:[%s544_s3 + $0x48] sm:$0xff]  ;;  %v34_v33 = vld [vmem:[%s542_s1 + $0x60] sm:$0xff] }
   0x9   :  { %341 = vmatpush3.bf16.msra.mxu0 %v338_v5  ;;  %371 = vmatprep.subr.bf16.mxu1 %v370_v17  ;;  %v354_v32 = vpack.c.bf16 %v33_v28, %v32_v27  ;;  %v35_v34 = vld [vmem:[%s542_s1 + $0x68] sm:$0xff]  ;;  %v382_v35 = vpack.c.bf16 %v131_v31, %v130_v30  ;;  %v132_v36 = vld [vmem:[%s544_s3 + $0x50] sm:$0xff]  ;;  %v133_v37 = vld [vmem:[%s544_s3 + $0x58] sm:$0xff] }
   0xa   :  { %343 = vmatprep.subr.bf16.mxu0 %v342_v8  ;;  %v358_v38 = vpack.c.bf16 %v35_v34, %v34_v33  ;;  %v36_v39 = vld [vmem:[%s542_s1 + $0x70] sm:$0xff]  ;;  %v37_v40 = vld [vmem:[%s542_s1 + $0x78] sm:$0xff]  ;;  %v386_v41 = vpack.c.bf16 %v133_v37, %v132_v36  ;;  %v134_v42 = vld [vmem:[%s544_s3 + $0x60] sm:$0xff] }
   0xb   :  { %v135_v43 = vld [vmem:[%s544_s3 + $0x68] sm:$0xff]  ;;  %v362_v44 = vpack.c.bf16 %v37_v40, %v36_v39  ;;  %v136_v47 = vld [vmem:[%s544_s3 + $0x70] sm:$0xff]  ;;  %v137_v48 = vld [vmem:[%s544_s3 + $0x78] sm:$0xff] }
   0xc   :  { %373 = vmatpush3.bf16.msra.mxu1 %v370_v17  ;;  %v390_v45 = vpack.c.bf16 %v135_v43, %v134_v42  ;;  %v21_v46 = vld [vmem:[%s543_s0 + $0x8] sm:$0xff]  ;;  %v394_v49 = vpack.c.bf16 %v137_v48, %v136_v47  ;;  %v226_v50 = vld [vmem:[%s545_s2] ss:$0 sm:$0xff] }
   0xd   :  { %345 = vmatpush3.bf16.msra.mxu0 %v342_v8  ;;  %375 = vmatprep.subr.bf16.mxu1 %v374_v23  ;;  %v227_v57 = vld [vmem:[%s546_s4] ss:$0 sm:$0xff] }
   0xe   :  { %347 = vmatprep.subr.bf16.mxu0 %v346_v20 }
  0x10   :  { %377 = vmatpush3.bf16.msra.mxu1 %v374_v23 }
  0x11   :  { %349 = vmatpush3.bf16.msra.mxu0 %v346_v20  ;;  %379 = vmatprep.subr.bf16.mxu1 %v378_v29 }
  0x12   :  { %351 = vmatprep.subr.bf16.mxu0 %v350_v26 }
  0x14   :  { %381 = vmatpush3.bf16.msra.mxu1 %v378_v29 }
  0x15   :  { %353 = vmatpush3.bf16.msra.mxu0 %v350_v26  ;;  %383 = vmatprep.subr.bf16.mxu1 %v382_v35 }
  0x16   :  { %355 = vmatprep.subr.bf16.mxu0 %v354_v32 }
  0x18   :  { %385 = vmatpush3.bf16.msra.mxu1 %v382_v35 }
  0x19   :  { %357 = vmatpush3.bf16.msra.mxu0 %v354_v32  ;;  %387 = vmatprep.subr.bf16.mxu1 %v386_v41 }
  0x1a   :  { %359 = vmatprep.subr.bf16.mxu0 %v358_v38 }
  0x1c   :  { %389 = vmatpush3.bf16.msra.mxu1 %v386_v41 }
  0x1d   :  { %361 = vmatpush3.bf16.msra.mxu0 %v358_v38  ;;  %391 = vmatprep.subr.bf16.mxu1 %v390_v45 }
  0x1e   :  { %363 = vmatprep.subr.bf16.mxu0 %v362_v44 }
  0x20   :  { %393 = vmatpush3.bf16.msra.mxu1 %v390_v45 }
  0x21   :  { %365 = vmatpush3.bf16.msra.mxu0 %v362_v44  ;;  %395 = vmatprep.subr.bf16.mxu1 %v394_v49 }
  0x24   :  { %297 = vmatmul.mubr.f32.vlgmr.msra.gmra.mrb[0].mxu0 %v21_v46  ;;  %397 = vmatpush3.bf16.msra.mxu1 %v394_v49 }
  0xf7   :  { %v298_v51 = vpop.f32.mrb[0].mxu0 }
  0xf8   :  { %v117_v52 = vadd.f32 %v298_v51, %v226_v50  ;;  %v111_v53 = vpop.f32.mrb[1].mxu0 }
  0xf9   :  { %v112_v54 = vadd.f32 %v226_v50, %v111_v53 }
  0xfa   :  { %v121_v56 = vmax.f32 %v117_v52, 0.0 }
  0xfb   :  { %v120_v55 = vmax.f32 %v112_v54, 0.0 }
  0xfd   :  { %331 = vmatprep.mubr.f32.mxu1 %v120_v55 }
  0xfe   :  { %332 = vmatmul.mubr.f32.vlgmr.msra.gmra.mrb[0].mxu1 %v121_v56 }
 0x1d1   :  { %v333_v58 = vpop.f32.mrb[0].mxu1 }
 0x1d2   :  { %v217_v59 = vadd.f32 %v333_v58, %v227_v57  ;;  %v211_v60 = vpop.f32.mrb[1].mxu1 }
 0x1d3   :  { %v212_v61 = vadd.f32 %v227_v57, %v211_v60 }
 0x1d4   :  { %221 = vst [vmem:[%s547_s5 + $0x8] sm:$0xff] %v217_v59 }
 0x1d5   :  { %220 = vst [vmem:[%s547_s5] sm:$0xff] %v212_v61 }

</bundles_post_ra>
